<compile_context>
chip_gen: v5e
topology: v5e:2x2
jax: 0.10.0
libtpu: 0.0.40
codegen_flags: <defaults>
</compile_context>

<pallas_src>
import jax
import jax.numpy as jnp
from jax.experimental import pallas as pl
from jax.experimental.pallas import tpu as pltpu


def _round_up(x, m):
    return (x + m - 1) // m * m


def _choose_tiling(B, block_b):
    """Returns (TB, B_pad, num_tiles). TB is lane-aligned (multiple of 128)."""
    B128 = _round_up(max(B, 1), 128)
    if B128 < 8192 and B128 <= block_b:
        return B128, B128, 1                      # small batch: single tile
    # Big batch: multiple-of-512 tiles, even tile count for v7x's two TCs.
    B512 = _round_up(B128, 512)
    nt = -(-B512 // block_b)
    if nt < 2:
        nt = 2
    if nt % 2:
        nt += 1
    TB = _round_up(-(-B512 // nt), 512)
    return TB, TB * nt, nt


def _make_kernel(num_chunks, chunk):
    def kernel(cat_ref, w1_ref, w2_ref, b2_ref, out_ref):
        # cat_ref: (K_pad, TB)    transposed [x | a | 1 | 0-pad], batch on lanes
        # w1_ref : (H_pad, K_pad) [W1^T | b1 | 0-pad], resident
        # w2_ref : (H_pad, chunk) fc2 column replicated across `chunk` lanes
        # b2_ref : (1, 1) scalar in SMEM
        # out_ref: (1, TB)        lane-dense q row
        w1 = w1_ref[...]                          # (H_pad, K_pad), stays in vregs
        b2 = b2_ref[0, 0]
        for c in range(num_chunks):               # static, fully unrolled
            col = c * chunk
            cat_c = cat_ref[:, pl.ds(col, chunk)]                      # (K_pad, chunk)
            h = jnp.dot(w1, cat_c, preferred_element_type=jnp.float32)  # (H_pad, chunk)
            h = jnp.maximum(h, 0.0)                                    # ReLU (VPU)
            # fc2: elementwise mul + sublane reduction -> (1, chunk) row
            q = jnp.sum(h * w2_ref[...], axis=0, keepdims=True) + b2
            out_ref[:, pl.ds(col, chunk)] = q.astype(out_ref.dtype)
    return kernel


def qvalue_forward(x, a, w1, b1, w2, b2, *, block_b=8192):
    """DDPG critic: q = fc2(relu(fc1(concat([x, a], 1)))).

    x : (B, state_dim), a : (B, action_dim)
    w1: (state_dim + action_dim, hidden)   == PyTorch fc1.weight.T
    b1: (1, hidden)
    w2: (hidden, 1)                        == PyTorch fc2.weight.T
    b2: (1, 1)
    returns (B, 1) float32
    """
    f32 = jnp.float32
    B, state_dim = x.shape
    action_dim = a.shape[1]
    in_dim = state_dim + action_dim
    hidden = w1.shape[1]

    H_pad = _round_up(hidden, 128)
    K_pad = _round_up(in_dim + 1, 8)          # +1: bias row folded into the dot

    TB, B_pad, num_tiles = _choose_tiling(B, block_b)
    if TB % 512 == 0:
        chunk = 512
    elif TB % 256 == 0:
        chunk = 256
    else:
        chunk = 128
    num_chunks = TB // chunk

    # ---- operand preprocessing (tiny XLA ops, ~16 B/row extra HBM) ----------
    cat = jnp.concatenate(
        [x.astype(f32), a.astype(f32), jnp.ones((B, 1), f32)], axis=1)   # (B, in_dim+1)
    cat_t = jnp.zeros((K_pad, B_pad), f32).at[:in_dim + 1, :B].set(cat.T)

    w1_aug = jnp.zeros((H_pad, K_pad), f32)
    w1_aug = w1_aug.at[:hidden, :in_dim].set(w1.astype(f32).T)
    w1_aug = w1_aug.at[:hidden, in_dim].set(b1.reshape(hidden).astype(f32))

    w2_col = jnp.zeros((H_pad, 1), f32).at[:hidden, 0].set(
        w2.reshape(hidden).astype(f32))
    w2_bcast = jnp.tile(w2_col, (1, chunk))                              # (H_pad, chunk)

    b2_s = jnp.asarray(b2, f32).reshape(1, 1)

    def resident(shape):
        return pl.BlockSpec(shape, lambda i: (0,) * len(shape))

    flops = 2 * B_pad * H_pad * (K_pad + 1)
    bytes_accessed = 4 * (B_pad * (K_pad + 1) + H_pad * (K_pad + chunk) + 1)

    out = pl.pallas_call(
        _make_kernel(num_chunks, chunk),
        out_shape=jax.ShapeDtypeStruct((1, B_pad), f32),
        grid=(num_tiles,),
        in_specs=[
            pl.BlockSpec((K_pad, TB), lambda i: (0, i)),        # cat_aug^T tile
            resident((H_pad, K_pad)),                           # W1_aug (resident)
            resident((H_pad, chunk)),                           # w2, lane-replicated
            pl.BlockSpec(memory_space=pltpu.MemorySpace.SMEM),  # b2 scalar
        ],
        out_specs=pl.BlockSpec((1, TB), lambda i: (0, i)),      # lane-dense q row
        compiler_params=pltpu.CompilerParams(
            dimension_semantics=("parallel",)),
        cost_estimate=pl.CostEstimate(
            flops=flops, transcendentals=0, bytes_accessed=bytes_accessed),
    )(cat_t, w1_aug, w2_bcast, b2_s)

    return out.reshape(B_pad, 1)[:B]


def init_params(key, state_dim, action_dim, hidden_dim):
    """Deterministic init matching torch.nn.Linear default (uniform +-1/sqrt(fan_in))."""
    k1, k2, k3, k4 = jax.random.split(key, 4)
    in1 = state_dim + action_dim
    bound1 = 1.0 / jnp.sqrt(in1)
    bound2 = 1.0 / jnp.sqrt(hidden_dim)
    # Stored as (in_features, out_features) == PyTorch weight.T
    w1 = jax.random.uniform(k1, (in1, hidden_dim), jnp.float32, -bound1, bound1)
    b1 = jax.random.uniform(k2, (1, hidden_dim), jnp.float32, -bound1, bound1)
    w2 = jax.random.uniform(k3, (hidden_dim, 1), jnp.float32, -bound2, bound2)
    b2 = jax.random.uniform(k4, (1, 1), jnp.float32, -bound2, bound2)
    return w1, b1, w2, b2


def _reference(x, a, w1, b1, w2, b2):
    cat = jnp.concatenate([x, a], axis=1)
    return jnp.maximum(cat @ w1 + b1, 0.0) @ w2 + b2


if __name__ == "__main__":
    # Pendulum-v1: state_dim=3, action_dim=1; hidden_dim=64 from the module.
    state_dim, action_dim, hidden_dim = 3, 1, 64

    key = jax.random.PRNGKey(0)
    kx, ka, kp, kx2, ka2 = jax.random.split(key, 5)
    w1, b1, w2, b2 = init_params(kp, state_dim, action_dim, hidden_dim)

    qvalue = jax.jit(qvalue_forward)

    # Case 1: tiny batch (single tile, single chunk).
    B1 = 8
    x1 = jax.random.normal(kx, (B1, state_dim), jnp.float32)
    a1 = jax.random.normal(ka, (B1, action_dim), jnp.float32)
    q1 = jax.block_until_ready(qvalue(x1, a1, w1, b1, w2, b2))
    ref1 = _reference(x1, a1, w1, b1, w2, b2)
    assert q1.shape == (B1, 1)
    assert jnp.allclose(q1, ref1, atol=1e-4, rtol=1e-4), "mismatch vs reference (B=8)"

    # Case 2: non-multiple-of-128 batch (exercises batch padding + chunk loop).
    B2 = 300
    x2 = jax.random.normal(kx2, (B2, state_dim), jnp.float32)
    a2 = jax.random.normal(ka2, (B2, action_dim), jnp.float32)
    q2 = jax.block_until_ready(qvalue(x2, a2, w1, b1, w2, b2))
    ref2 = _reference(x2, a2, w1, b1, w2, b2)
    assert q2.shape == (B2, 1)
    assert jnp.allclose(q2, ref2, atol=1e-4, rtol=1e-4), "mismatch vs reference (B=300)"

    print("KERNEL_OK")
</pallas_src>

<mosaic_0001>
module attributes {stable_mosaic.version = 11 : i64} {
  func.func @kernel(%arg0: i32, %arg1: memref<8x128xf32, #tpu.memory_space<vmem>>, %arg2: memref<128x8xf32, #tpu.memory_space<vmem>>, %arg3: memref<128x128xf32, #tpu.memory_space<vmem>>, %arg4: memref<1x1xf32, #tpu.memory_space<smem>>, %arg5: memref<1x128xf32, #tpu.memory_space<vmem>>) attributes {dimension_semantics = [#tpu.dimension_semantics<parallel>], iteration_bounds = array<i64: 1>, scalar_prefetch = 0 : i64, scratch_operands = 0 : i64, tpu.core_type = #tpu.core_type<tc>, window_params = [{transform_indices = @transform_0, window_bounds = array<i64: 8, 128>}, {pipeline_mode = #tpu.pipeline_mode<synchronous>, transform_indices = @transform_1, window_bounds = array<i64: 128, 8>}, {pipeline_mode = #tpu.pipeline_mode<synchronous>, transform_indices = @transform_2, window_bounds = array<i64: 128, 128>}, {transform_indices = @transform_3, window_bounds = array<i64: 1, 1>}, {transform_indices = @transform_4, window_bounds = array<i64: 1, 128>}]} {
    %c0 = arith.constant 0 : index
    %c0_0 = arith.constant 0 : index
    %0 = vector.load %arg2[%c0, %c0_0] : memref<128x8xf32, #tpu.memory_space<vmem>>, vector<128x8xf32>
    %c0_1 = arith.constant 0 : index
    %c0_2 = arith.constant 0 : index
    %1 = memref.load %arg4[%c0_1, %c0_2] : memref<1x1xf32, #tpu.memory_space<smem>>
    %c0_3 = arith.constant 0 : index
    %c0_4 = arith.constant 0 : index
    %2 = vector.load %arg1[%c0_3, %c0_4] : memref<8x128xf32, #tpu.memory_space<vmem>>, vector<8x128xf32>
    %cst = arith.constant dense<0.000000e+00> : vector<128x128xf32>
    %3 = tpu.matmul %0, %2, %cst {dimension_numbers = #tpu.dot_dimension_numbers<[1], [0], [0], [1], [0, 0, 1, 1], [], []>} : vector<128x8xf32>, vector<8x128xf32>, vector<128x128xf32> -> vector<128x128xf32>
    %cst_5 = arith.constant 0.000000e+00 : f32
    %4 = vector.broadcast %cst_5 : f32 to vector<128x128xf32>
    %5 = arith.maximumf %3, %4 : vector<128x128xf32>
    %c0_6 = arith.constant 0 : index
    %c0_7 = arith.constant 0 : index
    %6 = vector.load %arg3[%c0_6, %c0_7] : memref<128x128xf32, #tpu.memory_space<vmem>>, vector<128x128xf32>
    %7 = arith.mulf %5, %6 : vector<128x128xf32>
    %cst_8 = arith.constant dense<0.000000e+00> : vector<128xf32>
    %8 = vector.multi_reduction <add>, %7, %cst_8 [0] : vector<128x128xf32> to vector<128xf32>
    %9 = vector.shape_cast %8 : vector<128xf32> to vector<1x128xf32>
    %10 = vector.broadcast %1 : f32 to vector<1x128xf32>
    %11 = arith.addf %9, %10 : vector<1x128xf32>
    %c0_9 = arith.constant 0 : index
    %c0_10 = arith.constant 0 : index
    %12 = vector.load %arg5[%c0_9, %c0_10] : memref<1x128xf32, #tpu.memory_space<vmem>>, vector<1x128xf32>
    tpu.vector_store %arg5[%c0_9, %c0_10], %11 {strides = array<i32>} : memref<1x128xf32, #tpu.memory_space<vmem>>, vector<1x128xf32>,
    return
  }
  func.func @transform_0(%arg0: i32) -> (i32, i32) {
    %c0_i32 = arith.constant 0 : i32
    %c0_i32_0 = arith.constant 0 : i32
    return %c0_i32, %arg0 : i32, i32
  }
  func.func @transform_1(%arg0: i32) -> (i32, i32) {
    %c0_i32 = arith.constant 0 : i32
    %c0_i32_0 = arith.constant 0 : i32
    %c0_i32_1 = arith.constant 0 : i32
    return %c0_i32, %c0_i32_0 : i32, i32
  }
  func.func @transform_2(%arg0: i32) -> (i32, i32) {
    %c0_i32 = arith.constant 0 : i32
    %c0_i32_0 = arith.constant 0 : i32
    %c0_i32_1 = arith.constant 0 : i32
    return %c0_i32, %c0_i32_0 : i32, i32
  }
  func.func @transform_3(%arg0: i32) -> (i32, i32) {
    %c0_i32 = arith.constant 0 : i32
    %c0_i32_0 = arith.constant 0 : i32
    %c0_i32_1 = arith.constant 0 : i32
    return %c0_i32, %c0_i32_0 : i32, i32
  }
  func.func @transform_4(%arg0: i32) -> (i32, i32) {
    %c0_i32 = arith.constant 0 : i32
    %c0_i32_0 = arith.constant 0 : i32
    return %c0_i32, %arg0 : i32, i32
  }
}

</mosaic_0001>

<bundles_post_ra>
// kernel: qvalue_forward.1
= control target key start
LH: loop header
LB: loop body
LE: loop exit
PB: predicated region body
PF: predicated region fallthrough
CT: control target
= control target key end

     0   :  { %vm36_vm0 = vcmask 64512   ;;  %s394_s0 = inlined_call_operand.vmem [shape: f32[8,128], index: 0, kind: input, shape index: {}]   ;;  %s395_s1 = inlined_call_operand.vmem [shape: f32[128,8], index: 1, kind: input, shape index: {}]   ;;  %s396_s2 = inlined_call_operand.vmem [shape: f32[128,128], index: 2, kind: input, shape index: {}]   ;;  %s397_s3 = inlined_call_operand.<no memory space> [shape: f32[1,1], index: 3, kind: input, shape index: {}]   ;;  %s398_s4 = inlined_call_operand.vmem [shape: f32[1,128], index: 4, kind: output, shape index: {}]  }
   0x1   :  { %v35_v0 = vld [vmem:[%s394_s0] sm:$0xff]  ;;  %v19_v5 = vld [vmem:[%s395_s1 + $0x8] sm:$0xff]  ;;  %v20_v9 = vld [vmem:[%s395_s1 + $0x10] sm:$0xff] }
   0x2   :  { %v18_v1 = vld [vmem:[%s395_s1] sm:$0xff]  ;;  %100 = vmatpush.msra.mxu0 %v35_v0  ;;  %242 = vmatpush.msra.mxu1 %v35_v0  ;;  %v23_v6 = vld [vmem:[%s395_s1 + $0x28] sm:$0xff]  ;;  %v24_v10 = vld [vmem:[%s395_s1 + $0x30] sm:$0xff] }
   0x3   :  { %v22_v2 = vld [vmem:[%s395_s1 + $0x20] sm:$0xff]  ;;  %226 = vmatmul.msk.f32.vlgmr.msra.gmra.mxu0 %vm36_vm0, %v18_v1  ;;  %243 = vmatpush.msra.mxu2 %v35_v0  ;;  %v27_v7 = vld [vmem:[%s395_s1 + $0x48] sm:$0xff]  ;;  %v28_v11 = vld [vmem:[%s395_s1 + $0x50] sm:$0xff] }
   0x4   :  { %v26_v3 = vld [vmem:[%s395_s1 + $0x40] sm:$0xff]  ;;  %230 = vmatmul.msk.f32.vlgmr.msra.gmra.mxu1 %vm36_vm0, %v22_v2  ;;  %244 = vmatpush.msra.mxu3 %v35_v0  ;;  %v31_v8 = vld [vmem:[%s395_s1 + $0x68] sm:$0xff]  ;;  %v32_v12 = vld [vmem:[%s395_s1 + $0x70] sm:$0xff] }
   0x5   :  { %v30_v4 = vld [vmem:[%s395_s1 + $0x60] sm:$0xff]  ;;  %234 = vmatmul.msk.f32.vlgmr.msra.gmra.mxu2 %vm36_vm0, %v26_v3  ;;  %v21_v13 = vld [vmem:[%s395_s1 + $0x18] sm:$0xff]  ;;  %v167_v27 = vld [vmem:[%s396_s2 + $0x8] sm:$0xff] }
   0x6   :  { %238 = vmatmul.msk.f32.vlgmr.msra.gmra.mxu3 %vm36_vm0, %v30_v4  ;;  %v25_v14 = vld [vmem:[%s395_s1 + $0x38] sm:$0xff]  ;;  %v166_v30 = vld [vmem:[%s396_s2] sm:$0xff]  ;;  %v168_v31 = vld [vmem:[%s396_s2 + $0x10] sm:$0xff] }
   0x7   :  { %v29_v15 = vld [vmem:[%s395_s1 + $0x58] sm:$0xff]  ;;  %v170_v42 = vld [vmem:[%s396_s2 + $0x20] sm:$0xff]  ;;  %v171_v47 = vld [vmem:[%s396_s2 + $0x28] sm:$0xff] }
   0x8   :  { %v33_v16 = vld [vmem:[%s395_s1 + $0x78] sm:$0xff]  ;;  %v172_v52 = vld [vmem:[%s396_s2 + $0x30] sm:$0xff]  ;;  %v174_v61 = vld [vmem:[%s396_s2 + $0x40] sm:$0xff] }
   0x9   :  { %v169_v37 = vld [vmem:[%s396_s2 + $0x18] sm:$0xff]  ;;  %v175_v1 = vld [vmem:[%s396_s2 + $0x48] sm:$0xff] }
   0xa   :  { %v173_v53 = vld [vmem:[%s396_s2 + $0x38] sm:$0xff] }
   0xb   :  { %227 = vmatmul.msk.f32.gmra.mxu0 %vm36_vm0, %v19_v5 }
   0xc   :  { %231 = vmatmul.msk.f32.gmra.mxu1 %vm36_vm0, %v23_v6  ;;  %v176_v6 = vld [vmem:[%s396_s2 + $0x50] sm:$0xff] }
   0xd   :  { %235 = vmatmul.msk.f32.gmra.mxu2 %vm36_vm0, %v27_v7  ;;  %v177_v7 = vld [vmem:[%s396_s2 + $0x58] sm:$0xff] }
   0xe   :  { %239 = vmatmul.msk.f32.gmra.mxu3 %vm36_vm0, %v31_v8 }
  0x13   :  { %228 = vmatmul.msk.f32.gmra.mxu0 %vm36_vm0, %v20_v9 }
  0x14   :  { %232 = vmatmul.msk.f32.gmra.mxu1 %vm36_vm0, %v24_v10 }
  0x15   :  { %236 = vmatmul.msk.f32.gmra.mxu2 %vm36_vm0, %v28_v11 }
  0x16   :  { %240 = vmatmul.msk.f32.gmra.mxu3 %vm36_vm0, %v32_v12 }
  0x1b   :  { %229 = vmatmul.msk.f32.gmra.mxu0 %vm36_vm0, %v21_v13 }
  0x1c   :  { %233 = vmatmul.msk.f32.gmra.mxu1 %vm36_vm0, %v25_v14  ;;  %v178_v14 = vld [vmem:[%s396_s2 + $0x60] sm:$0xff] }
  0x1d   :  { %237 = vmatmul.msk.f32.gmra.mxu2 %vm36_vm0, %v29_v15 }
  0x1e   :  { %241 = vmatmul.msk.f32.gmra.mxu3 %vm36_vm0, %v33_v16 }
  0x80   :  { %v102_v17 = vpop.f32.mrf.mxu0 }
  0x81   :  { %v114_v18 = vpop.f32.mrf.mxu1  ;;  %v150_v28 = vmax.f32 %v102_v17, 0.0 }
  0x82   :  { %v154_v39 = vmax.f32 %v114_v18, 0.0  ;;  %v179_v18 = vld [vmem:[%s396_s2 + $0x68] sm:$0xff] }
  0x83   :  { %v182_v34 = vmul.f32 %v166_v30, %v150_v28 }
  0x84   :  { %v186_v48 = vmul.f32 %v170_v42, %v154_v39 }
  0x88   :  { %v105_v19 = vpop.f32.mrf.mxu0  ;;  %v126_v21 = vpop.f32.mrf.mxu2 }
  0x89   :  { %v117_v20 = vpop.f32.mrf.mxu1  ;;  %v337_v22 = vpop.f32.mrf.mxu3  ;;  %v151_v25 = vmax.f32 %v105_v19, 0.0  ;;  %v158_v57 = vmax.f32 %v126_v21, 0.0 }
  0x8a   :  { %v155_v45 = vmax.f32 %v117_v20, 0.0  ;;  %v162_v10 = vmax.f32 %v337_v22, 0.0  ;;  %v180_v22 = vld [vmem:[%s396_s2 + $0x70] sm:$0xff] }
  0x8b   :  { %v183_v32 = vmul.f32 %v167_v27, %v151_v25  ;;  %v190_v2 = vmul.f32 %v174_v61, %v158_v57 }
  0x8c   :  { %v187_v54 = vmul.f32 %v171_v47, %v155_v45  ;;  %v194_v19 = vmul.f32 %v178_v14, %v162_v10 }
  0x8d   :  { %v198_v38 = vadd.f32 %v183_v32, %v182_v34 }
  0x90   :  { %v108_v23 = vpop.f32.mrf.mxu0  ;;  %v129_v26 = vpop.f32.mrf.mxu2 }
  0x91   :  { %v120_v24 = vpop.f32.mrf.mxu1  ;;  %v152_v29 = vmax.f32 %v108_v23, 0.0  ;;  %v141_v33 = vpop.f32.mrf.mxu3  ;;  %v159_v0 = vmax.f32 %v129_v26, 0.0 }
  0x92   :  { %v156_v50 = vmax.f32 %v120_v24, 0.0  ;;  %v163_v17 = vmax.f32 %v141_v33, 0.0  ;;  %v181_v24 = vld [vmem:[%s396_s2 + $0x78] sm:$0xff] }
  0x93   :  { %v184_v35 = vmul.f32 %v168_v31, %v152_v29  ;;  %v191_v8 = vmul.f32 %v175_v1, %v159_v0 }
  0x94   :  { %v188_v58 = vmul.f32 %v172_v52, %v156_v50  ;;  %v195_v25 = vmul.f32 %v179_v18, %v163_v17 }
  0x95   :  { %v199_v44 = vadd.f32 %v198_v38, %v184_v35 }
  0x98   :  { %v111_v36 = vpop.f32.mrf.mxu0  ;;  %v132_v41 = vpop.f32.mrf.mxu2 }
  0x99   :  { %v153_v40 = vmax.f32 %v111_v36, 0.0  ;;  %v123_v43 = vpop.f32.mrf.mxu1  ;;  %v144_v56 = vpop.f32.mrf.mxu3  ;;  %v160_v4 = vmax.f32 %v132_v41, 0.0 }
  0x9a   :  { %v157_v51 = vmax.f32 %v123_v43, 0.0  ;;  %v164_v21 = vmax.f32 %v144_v56, 0.0 }
  0x9b   :  { %v185_v46 = vmul.f32 %v169_v37, %v153_v40  ;;  %v192_v11 = vmul.f32 %v176_v6, %v160_v4  ;;  %v219_v37 = vstv %s397_s3 }
  0x9c   :  { %v189_v60 = vmul.f32 %v173_v53, %v157_v51  ;;  %v196_v27 = vmul.f32 %v180_v22, %v164_v21 }
  0x9d   :  { %v200_v49 = vadd.f32 %v199_v44, %v185_v46 }
  0x9f   :  { %v201_v55 = vadd.f32 %v200_v49, %v186_v48 }
  0xa0   :  { %v135_v62 = vpop.f32.mrf.mxu2 }
  0xa1   :  { %v202_v59 = vadd.f32 %v201_v55, %v187_v54  ;;  %v161_v5 = vmax.f32 %v135_v62, 0.0  ;;  %v147_v15 = vpop.f32.mrf.mxu3 }
  0xa2   :  { %v165_v23 = vmax.f32 %v147_v15, 0.0 }
  0xa3   :  { %v203_v63 = vadd.f32 %v202_v59, %v188_v58  ;;  %v193_v13 = vmul.f32 %v177_v7, %v161_v5 }
  0xa4   :  { %v197_v29 = vmul.f32 %v181_v24, %v165_v23 }
  0xa5   :  { %v204_v3 = vadd.f32 %v203_v63, %v189_v60 }
  0xa7   :  { %v205_v9 = vadd.f32 %v204_v3, %v190_v2 }
  0xa9   :  { %v206_v12 = vadd.f32 %v205_v9, %v191_v8 }
  0xab   :  { %v207_v16 = vadd.f32 %v206_v12, %v192_v11 }
  0xad   :  { %v208_v20 = vadd.f32 %v207_v16, %v193_v13 }
  0xaf   :  { %v209_v26 = vadd.f32 %v208_v20, %v194_v19 }
  0xb1   :  { %v210_v28 = vadd.f32 %v209_v26, %v195_v25 }
  0xb3   :  { %v211_v30 = vadd.f32 %v210_v28, %v196_v27 }
  0xb5   :  { %v212_v31 = vadd.f32 %v211_v30, %v197_v29 }
  0xb7   :  { %v213_v32 = vrot.slane %v212_v31, 4 }
  0xb9   :  { %v214_v33 = vadd.f32 %v213_v32, %v212_v31 }
  0xbb   :  { %v215_v34 = vrot.slane %v214_v33, 2 }
  0xbd   :  { %v216_v35 = vadd.f32 %v215_v34, %v214_v33 }
  0xbf   :  { %v217_v36 = vrot.slane %v216_v35, 1 }
  0xc1   :  { %v218_v38 = vadd.f32 %v217_v36, %v216_v35 }
  0xc3   :  { %v220_v39 = vadd.f32 %v219_v37, %v218_v38 }
  0xc5   :  { %221 = vst [vmem:[%s398_s4] sm:$0x1] %v220_v39 }

</bundles_post_ra>
